<compile_context>
chip_gen: v6e
topology: v6e:2x2x1
jax: 0.10.0
libtpu: 0.0.40
codegen_flags: <defaults>
</compile_context>

<pallas_src>
import functools

import jax
import jax.numpy as jnp
from jax.experimental import pallas as pl
from jax.experimental.pallas import tpu as pltpu


def _round_up(x, m):
    return ((x + m - 1) // m) * m


# ----------------------------------------------------------------------------
# Fused MLP-decoder kernel: x -> relu(x@W0+b0) -> ... -> x@W_last+b_last
# Whole MLP in ONE pallas_call; weights/biases are VMEM-resident full blocks,
# hidden activations never touch HBM, only the final [tb, input_size] tile
# (lane-dense, multiple of 128 lanes) is written back.
# ----------------------------------------------------------------------------
def _mlp_decoder_kernel(*refs, n_layers):
    # refs layout: x_ref, (w0, b0, w1, b1, ..., w_{L-1}, b_{L-1}), o_ref
    x_ref = refs[0]
    o_ref = refs[-1]
    wb_refs = refs[1:-1]

    x = x_ref[...]  # [tb, z_dim]
    for i in range(n_layers):
        w_ref = wb_refs[2 * i]      # [Din, Dout]
        b_ref = wb_refs[2 * i + 1]  # [1,   Dout]
        w = w_ref[...]
        # Feed the MXU in the weight dtype (bf16 fast path), accumulate f32.
        acc = jnp.dot(x.astype(w.dtype), w,
                      preferred_element_type=jnp.float32)
        acc = acc + b_ref[...].astype(jnp.float32)
        if i != n_layers - 1:
            # ReLU on the f32 accumulator (v5e VPU has no bf16).
            x = jnp.maximum(acc, 0.0)
        else:
            o_ref[...] = acc.astype(o_ref.dtype)


def simple_mlp_decoder_forward(batch, params, activation="relu",
                               dropout_p=0.0, out_dtype=None):
    """Forward pass matching the PyTorch module semantics (eval, p=0).

    batch:  [B, z_dim]
    params: list of (W [Din, Dout], b [1, Dout]) per layer
    returns [B, input_size] in `out_dtype` (default: batch.dtype)
    """
    assert activation == "relu", "only ReLU activation implemented"
    assert dropout_p == 0.0
    # TODO(synk): dropout with p>0 in training mode is not implemented
    # (dropout_p=0 => identity, which is what the spec instantiates).

    B, z_dim = batch.shape
    n_layers = len(params)
    input_size = params[-1][0].shape[1]
    if out_dtype is None:
        out_dtype = batch.dtype

    # --- batch tile selection -----------------------------------------------
    #  * very large B: 512-row tiles (mem-bound sweet spot, many grid steps)
    #  * mid-size B (>=128): split into 2 tiles so both v7x TCs get work
    #  * tiny B: one tile, rounded to a multiple of 8 sublanes
    if B >= 1024:
        tb = 512
    elif B >= 128:
        tb = _round_up(pl.cdiv(B, 2), 8)
    else:
        tb = _round_up(B, 8)
    b_pad = _round_up(B, tb)

    x = batch
    if b_pad != B:
        x = jnp.pad(x, ((0, b_pad - B), (0, 0)))

    # --- specs ----------------------------------------------------------------
    # x is tiled over the batch grid axis; weights/biases are full-array blocks
    # with a constant block index (resident across the grid) and single-buffered
    # (no dead second pipeline buffer).
    in_specs = [pl.BlockSpec((tb, z_dim), lambda i: (i, 0))]
    flat_args = [x]
    weight_bytes = 0
    for w, b in params:
        din, dout = w.shape
        in_specs.append(pl.BlockSpec((din, dout), lambda i: (0, 0),
                                     pipeline_mode=pl.Buffered(1)))
        in_specs.append(pl.BlockSpec((1, dout), lambda i: (0, 0),
                                     pipeline_mode=pl.Buffered(1)))
        flat_args.append(w)
        flat_args.append(b)
        weight_bytes += (w.size * w.dtype.itemsize
                         + b.size * b.dtype.itemsize)

    # Advisory cost estimate for XLA's scheduler.
    dims = [z_dim] + [w.shape[1] for w, _ in params]
    flops = 2 * b_pad * sum(dims[i] * dims[i + 1] for i in range(n_layers))
    bytes_accessed = (b_pad * z_dim * x.dtype.itemsize
                      + weight_bytes
                      + b_pad * input_size * jnp.dtype(out_dtype).itemsize)

    kernel = functools.partial(_mlp_decoder_kernel, n_layers=n_layers)

    out = pl.pallas_call(
        kernel,
        out_shape=jax.ShapeDtypeStruct((b_pad, input_size), out_dtype),
        grid=(b_pad // tb,),
        in_specs=in_specs,
        out_specs=pl.BlockSpec((tb, input_size), lambda i: (i, 0)),
        compiler_params=pltpu.CompilerParams(
            dimension_semantics=("parallel",)),
        cost_estimate=pl.CostEstimate(flops=flops, transcendentals=0,
                                      bytes_accessed=bytes_accessed),
    )(*flat_args)

    if b_pad != B:
        out = out[:B]
    return out


# ----------------------------------------------------------------------------
# Parameter init (weights stored [F_in, F_out]; bias pre-reshaped to [1, F_out]).
# bf16 weights are the default (halved weight DMA, native bf16 MXU path);
# accumulation stays f32 inside the kernel.
# ----------------------------------------------------------------------------
def init_simple_mlp_decoder_params(key, input_size, z_dim, layers_sizes,
                                   dtype=jnp.bfloat16):
    dims = [z_dim] + list(layers_sizes) + [input_size]
    params = []
    for i in range(len(dims) - 1):
        key, kw, kb = jax.random.split(key, 3)
        fan_in = dims[i]
        scale = 1.0 / jnp.sqrt(jnp.asarray(fan_in, dtype=jnp.float32))
        w = (jax.random.normal(kw, (dims[i], dims[i + 1]), dtype=jnp.float32)
             * scale).astype(dtype)
        b = (jax.random.normal(kb, (1, dims[i + 1]), dtype=jnp.float32)
             * 0.01).astype(dtype)
        params.append((w, b))
    return params


# ----------------------------------------------------------------------------
# Reference (plain JAX) mirroring the kernel's cast points exactly
# ----------------------------------------------------------------------------
def reference_forward(batch, params, out_dtype=None):
    if out_dtype is None:
        out_dtype = batch.dtype
    x = batch.astype(jnp.float32)
    n_layers = len(params)
    for i, (w, b) in enumerate(params):
        xm = x.astype(w.dtype).astype(jnp.float32)
        wm = w.astype(jnp.float32)
        x = xm @ wm + b.astype(jnp.float32)
        if i != n_layers - 1:
            x = jnp.maximum(x, 0.0)
    return x.astype(out_dtype)


if __name__ == "__main__":
    # Small shapes consistent with the module's constructor.
    batch_size = 8
    z_dim = 32
    layers_sizes = [64, 128]
    input_size = 256
    activation = "relu"
    dropout_p = 0.0

    key = jax.random.PRNGKey(0)
    key, kx = jax.random.split(key)
    batch = jax.random.normal(kx, (batch_size, z_dim), dtype=jnp.float32)

    # --- f32 weights, f32 output (tight numerical check) -------------------
    params_f32 = init_simple_mlp_decoder_params(
        key, input_size, z_dim, layers_sizes, dtype=jnp.float32)
    out = simple_mlp_decoder_forward(batch, params_f32, activation, dropout_p)
    out = jax.block_until_ready(out)
    ref = reference_forward(batch, params_f32)
    assert out.shape == (batch_size, input_size)
    assert jnp.allclose(out, ref, atol=1e-4, rtol=1e-4), "f32 mismatch vs ref"

    # --- bf16 weights (default), f32 output ---------------------------------
    params_bf16 = init_simple_mlp_decoder_params(
        key, input_size, z_dim, layers_sizes)  # bf16 default
    out_bf16 = simple_mlp_decoder_forward(batch, params_bf16, activation,
                                          dropout_p)
    out_bf16 = jax.block_until_ready(out_bf16)
    ref_bf16 = reference_forward(batch, params_bf16)
    assert out_bf16.shape == (batch_size, input_size)
    assert jnp.allclose(out_bf16, ref_bf16, atol=5e-2, rtol=5e-2), \
        "bf16-weight mismatch vs ref"

    # --- bf16 weights, bf16 output (reduced HBM write traffic) -------------
    out_bb = simple_mlp_decoder_forward(batch, params_bf16, activation,
                                        dropout_p, out_dtype=jnp.bfloat16)
    out_bb = jax.block_until_ready(out_bb)
    ref_bb = reference_forward(batch, params_bf16, out_dtype=jnp.bfloat16)
    assert out_bb.shape == (batch_size, input_size)
    assert out_bb.dtype == jnp.bfloat16
    assert jnp.allclose(out_bb.astype(jnp.float32),
                        ref_bb.astype(jnp.float32),
                        atol=1e-1, rtol=1e-1), "bf16-output mismatch vs ref"

    # --- ragged mid-size batch: exercises padding + 2-way grid split -------
    key, kx2 = jax.random.split(key)
    batch_big = jax.random.normal(kx2, (300, z_dim), dtype=jnp.float32)
    out_big = simple_mlp_decoder_forward(batch_big, params_f32, activation,
                                         dropout_p)
    out_big = jax.block_until_ready(out_big)
    ref_big = reference_forward(batch_big, params_f32)
    assert out_big.shape == (300, input_size)
    assert jnp.allclose(out_big, ref_big, atol=1e-4, rtol=1e-4), \
        "tiled/padded batch mismatch vs ref"

    print("KERNEL_OK")
</pallas_src>

<mosaic_0001>
module attributes {stable_mosaic.version = 11 : i64} {
  func.func @_mlp_decoder_kernel(%arg0: i32, %arg1: memref<8x32xf32, #tpu.memory_space<vmem>>, %arg2: memref<32x64xf32, #tpu.memory_space<vmem>>, %arg3: memref<1x64xf32, #tpu.memory_space<vmem>>, %arg4: memref<64x128xf32, #tpu.memory_space<vmem>>, %arg5: memref<1x128xf32, #tpu.memory_space<vmem>>, %arg6: memref<128x256xf32, #tpu.memory_space<vmem>>, %arg7: memref<1x256xf32, #tpu.memory_space<vmem>>, %arg8: memref<8x256xf32, #tpu.memory_space<vmem>>) attributes {dimension_semantics = [#tpu.dimension_semantics<parallel>], iteration_bounds = array<i64: 1>, scalar_prefetch = 0 : i64, scratch_operands = 0 : i64, tpu.core_type = #tpu.core_type<tc>, window_params = [{transform_indices = @transform_0, window_bounds = array<i64: 8, 32>}, {pipeline_mode = #tpu.pipeline_mode<synchronous>, transform_indices = @transform_1, window_bounds = array<i64: 32, 64>}, {pipeline_mode = #tpu.pipeline_mode<synchronous>, transform_indices = @transform_2, window_bounds = array<i64: 1, 64>}, {pipeline_mode = #tpu.pipeline_mode<synchronous>, transform_indices = @transform_3, window_bounds = array<i64: 64, 128>}, {pipeline_mode = #tpu.pipeline_mode<synchronous>, transform_indices = @transform_4, window_bounds = array<i64: 1, 128>}, {pipeline_mode = #tpu.pipeline_mode<synchronous>, transform_indices = @transform_5, window_bounds = array<i64: 128, 256>}, {pipeline_mode = #tpu.pipeline_mode<synchronous>, transform_indices = @transform_6, window_bounds = array<i64: 1, 256>}, {transform_indices = @transform_7, window_bounds = array<i64: 8, 256>}]} {
    %c0 = arith.constant 0 : index
    %c0_0 = arith.constant 0 : index
    %0 = vector.load %arg1[%c0, %c0_0] : memref<8x32xf32, #tpu.memory_space<vmem>>, vector<8x32xf32>
    %c0_1 = arith.constant 0 : index
    %c0_2 = arith.constant 0 : index
    %1 = vector.load %arg2[%c0_1, %c0_2] : memref<32x64xf32, #tpu.memory_space<vmem>>, vector<32x64xf32>
    %cst = arith.constant dense<0.000000e+00> : vector<8x64xf32>
    %2 = tpu.matmul %0, %1, %cst {dimension_numbers = #tpu.dot_dimension_numbers<[1], [0], [0], [1], [0, 0, 1, 1], [], []>} : vector<8x32xf32>, vector<32x64xf32>, vector<8x64xf32> -> vector<8x64xf32>
    %c0_3 = arith.constant 0 : index
    %c0_4 = arith.constant 0 : index
    %3 = vector.load %arg3[%c0_3, %c0_4] : memref<1x64xf32, #tpu.memory_space<vmem>>, vector<1x64xf32>
    %4 = vector.broadcast %3 : vector<1x64xf32> to vector<8x64xf32>
    %5 = arith.addf %2, %4 : vector<8x64xf32>
    %cst_5 = arith.constant 0.000000e+00 : f32
    %6 = vector.broadcast %cst_5 : f32 to vector<8x64xf32>
    %7 = arith.maximumf %5, %6 : vector<8x64xf32>
    %c0_6 = arith.constant 0 : index
    %c0_7 = arith.constant 0 : index
    %8 = vector.load %arg4[%c0_6, %c0_7] : memref<64x128xf32, #tpu.memory_space<vmem>>, vector<64x128xf32>
    %cst_8 = arith.constant dense<0.000000e+00> : vector<8x128xf32>
    %9 = tpu.matmul %7, %8, %cst_8 {dimension_numbers = #tpu.dot_dimension_numbers<[1], [0], [0], [1], [0, 0, 1, 1], [], []>} : vector<8x64xf32>, vector<64x128xf32>, vector<8x128xf32> -> vector<8x128xf32>
    %c0_9 = arith.constant 0 : index
    %c0_10 = arith.constant 0 : index
    %10 = vector.load %arg5[%c0_9, %c0_10] : memref<1x128xf32, #tpu.memory_space<vmem>>, vector<1x128xf32>
    %11 = vector.broadcast %10 : vector<1x128xf32> to vector<8x128xf32>
    %12 = arith.addf %9, %11 : vector<8x128xf32>
    %cst_11 = arith.constant 0.000000e+00 : f32
    %13 = vector.broadcast %cst_11 : f32 to vector<8x128xf32>
    %14 = arith.maximumf %12, %13 : vector<8x128xf32>
    %c0_12 = arith.constant 0 : index
    %c0_13 = arith.constant 0 : index
    %15 = vector.load %arg6[%c0_12, %c0_13] : memref<128x256xf32, #tpu.memory_space<vmem>>, vector<128x256xf32>
    %cst_14 = arith.constant dense<0.000000e+00> : vector<8x256xf32>
    %16 = tpu.matmul %14, %15, %cst_14 {dimension_numbers = #tpu.dot_dimension_numbers<[1], [0], [0], [1], [0, 0, 1, 1], [], []>} : vector<8x128xf32>, vector<128x256xf32>, vector<8x256xf32> -> vector<8x256xf32>
    %c0_15 = arith.constant 0 : index
    %c0_16 = arith.constant 0 : index
    %17 = vector.load %arg7[%c0_15, %c0_16] : memref<1x256xf32, #tpu.memory_space<vmem>>, vector<1x256xf32>
    %18 = vector.broadcast %17 : vector<1x256xf32> to vector<8x256xf32>
    %19 = arith.addf %16, %18 : vector<8x256xf32>
    %c0_17 = arith.constant 0 : index
    %c0_18 = arith.constant 0 : index
    %20 = vector.load %arg8[%c0_17, %c0_18] : memref<8x256xf32, #tpu.memory_space<vmem>>, vector<8x256xf32>
    tpu.vector_store %arg8[%c0_17, %c0_18], %19 {strides = array<i32>} : memref<8x256xf32, #tpu.memory_space<vmem>>, vector<8x256xf32>,
    return
  }
  func.func @transform_0(%arg0: i32) -> (i32, i32) {
    %c0_i32 = arith.constant 0 : i32
    %c0_i32_0 = arith.constant 0 : i32
    return %arg0, %c0_i32 : i32, i32
  }
  func.func @transform_1(%arg0: i32) -> (i32, i32) {
    %c0_i32 = arith.constant 0 : i32
    %c0_i32_0 = arith.constant 0 : i32
    %c0_i32_1 = arith.constant 0 : i32
    return %c0_i32, %c0_i32_0 : i32, i32
  }
  func.func @transform_2(%arg0: i32) -> (i32, i32) {
    %c0_i32 = arith.constant 0 : i32
    %c0_i32_0 = arith.constant 0 : i32
    %c0_i32_1 = arith.constant 0 : i32
    return %c0_i32, %c0_i32_0 : i32, i32
  }
  func.func @transform_3(%arg0: i32) -> (i32, i32) {
    %c0_i32 = arith.constant 0 : i32
    %c0_i32_0 = arith.constant 0 : i32
    %c0_i32_1 = arith.constant 0 : i32
    return %c0_i32, %c0_i32_0 : i32, i32
  }
  func.func @transform_4(%arg0: i32) -> (i32, i32) {
    %c0_i32 = arith.constant 0 : i32
    %c0_i32_0 = arith.constant 0 : i32
    %c0_i32_1 = arith.constant 0 : i32
    return %c0_i32, %c0_i32_0 : i32, i32
  }
  func.func @transform_5(%arg0: i32) -> (i32, i32) {
    %c0_i32 = arith.constant 0 : i32
    %c0_i32_0 = arith.constant 0 : i32
    %c0_i32_1 = arith.constant 0 : i32
    return %c0_i32, %c0_i32_0 : i32, i32
  }
  func.func @transform_6(%arg0: i32) -> (i32, i32) {
    %c0_i32 = arith.constant 0 : i32
    %c0_i32_0 = arith.constant 0 : i32
    %c0_i32_1 = arith.constant 0 : i32
    return %c0_i32, %c0_i32_0 : i32, i32
  }
  func.func @transform_7(%arg0: i32) -> (i32, i32) {
    %c0_i32 = arith.constant 0 : i32
    %c0_i32_0 = arith.constant 0 : i32
    return %arg0, %c0_i32 : i32, i32
  }
}

</mosaic_0001>

<bundles_post_ra>
// kernel: tpu_custom_call.1
= control target key start
LH: loop header
LB: loop body
LE: loop exit
PB: predicated region body
PF: predicated region fallthrough
CT: control target
= control target key end

     0   :  { %12 = vsyncpa [#allocation3], 0  ;;  %s635_s0 = inlined_call_operand.hbm [shape: f32[8,32], index: 0, kind: input, shape index: {}]   ;;  %s636_s1 = inlined_call_operand.hbm [shape: f32[32,64], index: 1, kind: input, shape index: {}]   ;;  %s637_s2 = inlined_call_operand.vmem [shape: f32[1,64], index: 2, kind: input, shape index: {}]   ;;  %s638_s3 = inlined_call_operand.hbm [shape: f32[64,128], index: 3, kind: input, shape index: {}]   ;;  %s639_s4 = inlined_call_operand.vmem [shape: f32[1,128], index: 4, kind: input, shape index: {}]   ;;  %s640_s5 = inlined_call_operand.hbm [shape: f32[128,256], index: 5, kind: input, shape index: {}]   ;;  %s641_s6 = inlined_call_operand.vmem [shape: f32[1,256], index: 6, kind: input, shape index: {}]   ;;  %s642_s7 = inlined_call_operand.hbm [shape: f32[8,256], index: 7, kind: output, shape index: {}]  }
   0x1   :  { %13 = vsyncpa [#allocation6], 0 }
   0x2   :  { %14 = vsyncpa [#allocation9], 0 }
   0x3   :  { %15 = vsyncpa [#allocation4], 0  ;;  %s558_s24 = smov [#allocation5]  }
   0x4   :  { %s31_s25 = sshll.u32 %s558_s24, 4  ;;  %s32_s25 = int_to_ptr.vmem [resolvable:$true] %s31_s25 }
   0x5   :  { %s458_s26 = scalar_lea.vmem %s32_s25, 512  ;;  %p463_p1 = scmp.lt.s32.totalorder %s32_s25, %s32_s25 }
   0x6   :  { %p459_p0 = scmp.ne.s32.totalorder %s32_s25, %s458_s26  ;;  %p464_p2 = scmp.lt.s32.totalorder %s458_s26, %s458_s26 }
   0x8   :  { %p465_p3 = por %p464_p2, %p463_p1 }
   0xa   :  { %p466_p4 = pnand %p465_p3, %p459_p0 }
   0xc   :  { %469 = shalt.err (!%p466_p4)
}
   0xd   :  { %s559_s27 = smov 128   ;;  %s560_s28 = smov 8  }
   0xe   :  { %37 = dma.hbm_to_vmem [thread:$0]  %s636_s1, 512, %s32_s25, [#allocation6], %s559_s27, %s559_s27, %s560_s28  }
   0xf   :  { %s561_s8 = smov [#allocation2]   ;;  %s562_s10 = smov [#allocation7]  }
  0x10   :  { %s22_s9 = sshll.u32 %s561_s8, 4  ;;  %s45_s11 = sshll.u32 %s562_s10, 4  ;;  %s23_s9 = int_to_ptr.vmem [resolvable:$true] %s22_s9  ;;  %s46_s11 = int_to_ptr.vmem [resolvable:$true] %s45_s11 }
  0x11   :  { %s478_s12 = scalar_lea.vmem %s23_s9, 128  ;;  %p483_p6 = scmp.lt.s32.totalorder %s23_s9, %s23_s9 }
  0x12   :  { %p479_p5 = scmp.ne.s32.totalorder %s23_s9, %s478_s12  ;;  %p484_p7 = scmp.lt.s32.totalorder %s478_s12, %s478_s12 }
  0x14   :  { %p485_p8 = por %p484_p7, %p483_p6 }
  0x16   :  { %p486_p9 = pnand %p485_p8, %p479_p5 }
  0x18   :  { %489 = shalt.err (!%p486_p9)
}
  0x19   :  { %25 = dma.hbm_to_vmem [thread:$0]  %s635_s0, 128, %s23_s9, [#allocation3]  }
  0x1a   :  { %s498_s15 = scalar_lea.vmem %s46_s11, 1024  ;;  %p503_p11 = scmp.lt.s32.totalorder %s46_s11, %s46_s11 }
  0x1b   :  { %p499_p10 = scmp.ne.s32.totalorder %s46_s11, %s498_s15  ;;  %p504_p12 = scmp.lt.s32.totalorder %s498_s15, %s498_s15 }
  0x1d   :  { %p505_p13 = por %p504_p12, %p503_p11 }
  0x1f   :  { %p506_p0 = pnand %p505_p13, %p499_p10 }
  0x21   :  { %509 = shalt.err (!%p506_p0)
}
  0x22   :  { %51 = dma.hbm_to_vmem [thread:$0]  %s638_s3, 1024, %s46_s11, [#allocation6], %s559_s27, %s559_s27, %s560_s28  }
  0x23   :  { %s563_s17 = smov [#allocation8]  }
  0x24   :  { %s59_s18 = sshll.u32 %s563_s17, 4  ;;  %s60_s18 = int_to_ptr.vmem [resolvable:$true] %s59_s18 }
  0x25   :  { %s518_s19 = scalar_lea.vmem %s60_s18, 4096  ;;  %p523_p2 = scmp.lt.s32.totalorder %s60_s18, %s60_s18 }
  0x26   :  { %p519_p1 = scmp.ne.s32.totalorder %s60_s18, %s518_s19  ;;  %p524_p3 = scmp.lt.s32.totalorder %s518_s19, %s518_s19 }
  0x28   :  { %p525_p4 = por %p524_p3, %p523_p2 }
  0x2a   :  { %p526_p5 = pnand %p525_p4, %p519_p1 }
  0x2c   :  { %529 = shalt.err (!%p526_p5)
}
  0x2d   :  { %s564_s0 = smov 256   ;;  %s565_s20 = smov 16  }
  0x2e   :  { %65 = dma.hbm_to_vmem [thread:$0]  %s640_s5, 4096, %s60_s18, [#allocation9], %s564_s0, %s564_s0, %s565_s20  }
  0x2f   :  { %550 = dma.done.wait [#allocation3], 128  }
  0x30   :  { %551 = vsyncadd [#allocation3], 4294967168 }
  0x31   :  { %552 = dma.done.wait [#allocation6], 1536  }
  0x32   :  { %553 = vsyncadd [#allocation6], 4294965760 }
  0x33   :  { %554 = dma.done.wait [#allocation9], 4096  }
  0x34   :  { %555 = vsyncadd [#allocation9], 4294963200  ;;  %v566_v0 = vmov 0.0   ;;  %vm567_vm0 = vmmov 0   ;;  %v84_v1 = vld [vmem:[#allocation5 + $0x18] sm:$0xff]  ;;  %v83_v2 = vld [vmem:[#allocation5 + $0x10] sm:$0xff]  ;;  %v291_v56 = vlaneseq }
  0x35   :  { %409 = vmatprep.subr.mxu1 %v566_v0  ;;  %417 = vmatprep.mubr.msk.f32.mxu1 %vm567_vm0, %v566_v0  ;;  %v82_v3 = vld [vmem:[#allocation5 + $0x8] sm:$0xff]  ;;  %v81_v4 = vld [vmem:[#allocation5] sm:$0xff]  ;;  %v80_v5 = vld [vmem:[#allocation2] sm:$0xff]  ;;  %vm92_vm1 = vcmask 261120   ;;  %vm182_vm2 = vcmask 523264   ;;  %s568_s26 = smov [#allocation10]  }
  0x36   :  { %365 = vmatprep.mubr.f32.mxu0 %v566_v0  ;;  %410 = vmatpush3.msra.mxu1 %v84_v1  ;;  %v174_v6 = vld [vmem:[#allocation7 + $0x38] sm:$0xff]  ;;  %v173_v7 = vld [vmem:[#allocation7 + $0x30] sm:$0xff]  ;;  %v172_v8 = vld [vmem:[#allocation7 + $0x28] sm:$0xff]  ;;  %v292_v57 = vshrl.u32 %v291_v56, 7  ;;  %s380_s27 = sshll.u32 %s568_s26, 4  ;;  %s381_s27 = int_to_ptr.vmem [resolvable:$true] %s380_s27 }
  0x37   :  { %411 = vmatprep.subr.mxu1 %v566_v0  ;;  %v171_v9 = vld [vmem:[#allocation7 + $0x20] sm:$0xff]  ;;  %v170_v10 = vld [vmem:[#allocation7 + $0x18] sm:$0xff]  ;;  %v169_v11 = vld [vmem:[#allocation7 + $0x10] sm:$0xff]  ;;  %p535_p7 = scmp.lt.s32.totalorder %s381_s27, %s381_s27 }
  0x38   :  { %412 = vmatpush3.msra.mxu1 %v83_v2  ;;  %v168_v12 = vld [vmem:[#allocation7 + $0x8] sm:$0xff]  ;;  %v167_v13 = vld [vmem:[#allocation7] sm:$0xff]  ;;  %v288_v14 = vld [vmem:[#allocation8 + $0xf8] sm:$0xff]  ;;  %v293_v58 = vsub.s32 0, %v292_v57  ;;  %v297_v60 = vsub.s32 1, %v292_v57 }
  0x39   :  { %413 = vmatprep.subr.mxu1 %v566_v0  ;;  %v287_v15 = vld [vmem:[#allocation8 + $0xf0] sm:$0xff]  ;;  %v286_v16 = vld [vmem:[#allocation8 + $0xe8] sm:$0xff]  ;;  %301 = vmatprep.subr.mxu0 %v288_v14  ;;  %v285_v17 = vld [vmem:[#allocation8 + $0xe0] sm:$0xff] }
  0x3a   :  { %414 = vmatpush3.msra.mxu1 %v82_v3  ;;  %302 = vmatpush1.msra.mxu0 %v287_v15  ;;  %v284_v18 = vld [vmem:[#allocation8 + $0xd8] sm:$0xff]  ;;  %v283_v19 = vld [vmem:[#allocation8 + $0xd0] sm:$0xff]  ;;  %v282_v20 = vld [vmem:[#allocation8 + $0xc8] sm:$0xff] }
  0x3b   :  { %415 = vmatprep.subr.mxu1 %v566_v0  ;;  %303 = vmatprep.subr.mxu0 %v286_v16  ;;  %v281_v21 = vld [vmem:[#allocation8 + $0xc0] sm:$0xff]  ;;  %v280_v22 = vld [vmem:[#allocation8 + $0xb8] sm:$0xff]  ;;  %v279_v23 = vld [vmem:[#allocation8 + $0xb0] sm:$0xff] }
  0x3c   :  { %416 = vmatpush3.msra.mxu1 %v81_v4  ;;  %304 = vmatpush1.msra.mxu0 %v285_v17  ;;  %v278_v24 = vld [vmem:[#allocation8 + $0xa8] sm:$0xff]  ;;  %v277_v25 = vld [vmem:[#allocation8 + $0xa0] sm:$0xff]  ;;  %v276_v26 = vld [vmem:[#allocation8 + $0x98] sm:$0xff] }
  0x3d   :  { %418 = vmatmul.mubr.msk.f32.vlgmr.msra.gmra.mxu1 %vm92_vm1, %v80_v5  ;;  %420 = vmatprep.subr.mxu1 %v566_v0  ;;  %v275_v27 = vld [vmem:[#allocation8 + $0x90] sm:$0xff]  ;;  %v274_v28 = vld [vmem:[#allocation8 + $0x88] sm:$0xff]  ;;  %v273_v29 = vld [vmem:[#allocation8 + $0x80] sm:$0xff] }
  0x3e   :  { %421 = vmatpush3.msra.mxu1 %v174_v6  ;;  %436 = vmatprep.mubr.msk.f32.mxu1 %vm567_vm0, %v566_v0  ;;  %v272_v30 = vld [vmem:[#allocation8 + $0x78] sm:$0xff]  ;;  %v271_v31 = vld [vmem:[#allocation8 + $0x70] sm:$0xff]  ;;  %v270_v32 = vld [vmem:[#allocation8 + $0x68] sm:$0xff] }
  0x3f   :  { %422 = vmatprep.subr.mxu1 %v566_v0  ;;  %305 = vmatprep.subr.mxu0 %v284_v18  ;;  %v269_v33 = vld [vmem:[#allocation8 + $0x60] sm:$0xff]  ;;  %v268_v34 = vld [vmem:[#allocation8 + $0x58] sm:$0xff]  ;;  %v267_v35 = vld [vmem:[#allocation8 + $0x50] sm:$0xff] }
  0x40   :  { %423 = vmatpush3.msra.mxu1 %v173_v7  ;;  %306 = vmatpush1.msra.mxu0 %v283_v19  ;;  %v266_v36 = vld [vmem:[#allocation8 + $0x48] sm:$0xff]  ;;  %v265_v37 = vld [vmem:[#allocation8 + $0x40] sm:$0xff]  ;;  %v264_v38 = vld [vmem:[#allocation8 + $0x38] sm:$0xff] }
  0x41   :  { %424 = vmatprep.subr.mxu1 %v566_v0  ;;  %307 = vmatprep.subr.mxu0 %v282_v20  ;;  %v263_v39 = vld [vmem:[#allocation8 + $0x30] sm:$0xff]  ;;  %v262_v40 = vld [vmem:[#allocation8 + $0x28] sm:$0xff]  ;;  %v391_v41 = vld [vmem:[%s637_s2] ss:$0 sm:$0xff] }
  0x42   :  { %425 = vmatpush3.msra.mxu1 %v172_v8  ;;  %308 = vmatpush1.msra.mxu0 %v281_v21  ;;  %v261_v46 = vld [vmem:[#allocation8 + $0x20] sm:$0xff]  ;;  %v260_v47 = vld [vmem:[#allocation8 + $0x18] sm:$0xff]  ;;  %v259_v48 = vld [vmem:[#allocation8 + $0x10] sm:$0xff] }
  0x43   :  { %426 = vmatprep.subr.mxu1 %v566_v0  ;;  %309 = vmatprep.subr.mxu0 %v280_v22  ;;  %v258_v49 = vld [vmem:[#allocation8 + $0x8] sm:$0xff]  ;;  %v257_v50 = vld [vmem:[#allocation8] sm:$0xff]  ;;  %v393_v51 = vld [vmem:[%s639_s4] ss:$0 sm:$0xff]  ;;  %s530_s4 = scalar_lea.vmem %s381_s27, 256 }
  0x44   :  { %427 = vmatpush3.msra.mxu1 %v171_v9  ;;  %310 = vmatpush1.msra.mxu0 %v279_v23  ;;  %v289_v59 = vld [vmem:[%s641_s6] sm:$0x3]  ;;  %p531_p6 = scmp.ne.s32.totalorder %s381_s27, %s530_s4  ;;  %p536_p8 = scmp.lt.s32.totalorder %s530_s4, %s530_s4 }
  0x45   :  { %428 = vmatprep.subr.mxu1 %v566_v0  ;;  %311 = vmatprep.subr.mxu0 %v278_v24  ;;  %v294_v61 = vrot.slane %v289_v59, %v293_v58  ;;  %v298_v62 = vrot.slane %v289_v59, %v297_v60 }
  0x46   :  { %429 = vmatpush3.msra.mxu1 %v170_v10  ;;  %312 = vmatpush1.msra.mxu0 %v277_v25  ;;  %p537_p9 = por %p536_p8, %p535_p7 }
  0x47   :  { %430 = vmatprep.subr.mxu1 %v566_v0  ;;  %313 = vmatprep.subr.mxu0 %v276_v26 }
  0x48   :  { %431 = vmatpush3.msra.mxu1 %v169_v11  ;;  %314 = vmatpush1.msra.mxu0 %v275_v27  ;;  %p538_p10 = pnand %p537_p9, %p531_p6 }
  0x49   :  { %432 = vmatprep.subr.mxu1 %v566_v0  ;;  %315 = vmatprep.subr.mxu0 %v274_v28 }
  0x4a   :  { %433 = vmatpush3.msra.mxu1 %v168_v12  ;;  %316 = vmatpush1.msra.mxu0 %v273_v29 }
  0x4b   :  { %434 = vmatprep.subr.mxu1 %v566_v0  ;;  %317 = vmatprep.subr.mxu0 %v272_v30 }
  0x4c   :  { %435 = vmatpush3.msra.mxu1 %v167_v13  ;;  %318 = vmatpush1.msra.mxu0 %v271_v31 }
  0x4d   :  { %319 = vmatprep.subr.mxu0 %v270_v32 }
  0x4e   :  { %320 = vmatpush1.msra.mxu0 %v269_v33 }
  0x4f   :  { %321 = vmatprep.subr.mxu0 %v268_v34 }
  0x50   :  { %322 = vmatpush1.msra.mxu0 %v267_v35 }
  0x51   :  { %323 = vmatprep.subr.mxu0 %v266_v36 }
  0x52   :  { %324 = vmatpush1.msra.mxu0 %v265_v37 }
  0x53   :  { %325 = vmatprep.subr.mxu0 %v264_v38 }
  0x54   :  { %326 = vmatpush1.msra.mxu0 %v263_v39 }
  0x55   :  { %327 = vmatprep.subr.mxu0 %v262_v40 }
  0x56   :  { %328 = vmatpush1.msra.mxu0 %v261_v46 }
  0x57   :  { %329 = vmatprep.subr.mxu0 %v260_v47 }
  0x58   :  { %330 = vmatpush1.msra.mxu0 %v259_v48 }
  0x59   :  { %331 = vmatprep.subr.mxu0 %v258_v49 }
  0x5a   :  { %332 = vmatpush1.msra.mxu0 %v257_v50 }
  0xfd   :  { %v162_v42 = vpop.f32.mrf.mxu1 }
  0xfe   :  { %v163_v43 = vadd.f32 %v391_v41, %v162_v42 }
  0xff   :  { %v419_v44 = vpop.f32.mrf.mxu1 }
 0x100   :  { %v166_v45 = vmax.f32 %v163_v43, 0.0 }
 0x102   :  { %437 = vmatmul.mubr.msk.f32.vlgmr.msra.gmra.mxu1 %vm182_vm2, %v166_v45 }
 0x1c2   :  { %v252_v52 = vpop.f32.mrf.mxu1 }
 0x1c3   :  { %v253_v53 = vadd.f32 %v393_v51, %v252_v52 }
 0x1c4   :  { %v438_v54 = vpop.f32.mrf.mxu1 }
 0x1c5   :  { %v256_v55 = vmax.f32 %v253_v53, 0.0 }
 0x1c7   :  { %366 = vmatmul.mubr.f32.vlgmr.msra.gmra.mxu0 %v256_v55 }
 0x287   :  { %v367_v63 = vpop.f32.mrf.mxu0 }
 0x288   :  { %v368_v0 = vadd.f32 %v367_v63, %v294_v61 }
 0x289   :  { %v369_v1 = vpop.f32.mrf.mxu0 }
 0x28a   :  { %372 = vst [vmem:[#allocation10] sm:$0xff] %v368_v0  ;;  %v370_v2 = vadd.f32 %v369_v1, %v298_v62 }
 0x28c   :  { %373 = vst [vmem:[#allocation10 + $0x8] sm:$0xff] %v370_v2 }
 0x28d   :  { %541 = shalt.err (!%p538_p10)
}
 0x28e   :  { %383 = dma.vmem_to_hbm [thread:$0]  %s381_s27, 256, %s642_s7, [#allocation4]  }
 0x28f   :  { %556 = dma.done.wait [#allocation4], 256  }
 0x290   :  { %557 = vsyncadd [#allocation4], 4294967040 }
 0x291   :  { %387 = vsyncpa [#allocation3], 1 }
 0x292   :  { %388 = vsyncpa [#allocation6], 1 }
 0x293   :  { %389 = vsyncpa [#allocation9], 1 }
 0x294   :  { %390 = vsyncpa [#allocation4], 1 }

</bundles_post_ra>
